<compile_context>
chip_gen: v6e
topology: v6e:2x2x1
jax: 0.10.0
libtpu: 0.0.40
codegen_flags: <defaults>
</compile_context>

<pallas_src>
import jax
import jax.numpy as jnp
from jax import lax
from jax.experimental import pallas as pl
from jax.experimental.pallas import tpu as pltpu

SMOOTH = 1.0


def _dice_partial_kernel(yp_ref, yt_ref, o_ref, acc_inter, acc_sum):
    # Grid: (N, num_h_tiles).  Axis 1 is the in-image reduction axis.
    h = pl.program_id(1)

    @pl.when(h == 0)
    def _init():
        acc_inter[...] = jnp.zeros_like(acc_inter)
        acc_sum[...] = jnp.zeros_like(acc_sum)

    # Stream native dtype, cast in-kernel (VPU work hides under the DMA).
    yp = yp_ref[...].astype(jnp.float32)
    yt = yt_ref[...].astype(jnp.float32)
    # Pure elementwise accumulation per step; no cross-lane reduce here.
    acc_inter[...] += yp * yt
    acc_sum[...] += yp + yt

    @pl.when(h == pl.num_programs(1) - 1)
    def _finalize():
        inter = jnp.sum(acc_inter[...])   # single XLU reduce per batch element
        total = jnp.sum(acc_sum[...])
        # Build the (8, 128) output block with a full vector store
        # (lane 0 -> intersection, lane 1 -> sum(yp)+sum(yt)).
        row = lax.broadcasted_iota(jnp.int32, o_ref.shape, 0)
        col = lax.broadcasted_iota(jnp.int32, o_ref.shape, 1)
        vals = jnp.where((row == 0) & (col == 0), inter,
                         jnp.where((row == 0) & (col == 1), total, 0.0))
        o_ref[...] = vals.astype(o_ref.dtype)


def _pick_h_tile(H, W, itemsize):
    """Largest multiple-of-8 divisor of H keeping a tile under ~512 KiB."""
    cap_elems = (512 * 1024) // max(int(itemsize), 1)
    if H * W <= cap_elems or H % 8 != 0:
        # Full rows per block ("block dim == full array dim" is always legal).
        return H
    t = min(H, max(8, (cap_elems // max(W, 1)) // 8 * 8))
    while t >= 8:
        if H % t == 0:
            return t
        t -= 8
    return H


def dice_loss(y_pred, y_true):
    assert y_pred.shape == y_true.shape
    N, C, H, W = y_pred.shape

    itemsize = max(jnp.dtype(y_pred.dtype).itemsize,
                   jnp.dtype(y_true.dtype).itemsize)
    h_tile = _pick_h_tile(H, W, itemsize)
    num_h = H // h_tile

    elems = N * H * W  # channel-0 elements actually streamed per input
    cost = pl.CostEstimate(
        flops=4 * elems,
        transcendentals=0,
        bytes_accessed=elems * (jnp.dtype(y_pred.dtype).itemsize
                                + jnp.dtype(y_true.dtype).itemsize)
        + N * 8 * 128 * 4,
    )

    # Channel-0 select via index_map; N and C are squeezed (size-1 blocks).
    in_spec_pred = pl.BlockSpec((None, None, h_tile, W),
                                lambda n, h: (n, 0, h, 0))
    in_spec_true = pl.BlockSpec((None, None, h_tile, W),
                                lambda n, h: (n, 0, h, 0))

    partials = pl.pallas_call(
        _dice_partial_kernel,
        out_shape=jax.ShapeDtypeStruct((N, 8, 128), jnp.float32),
        grid=(N, num_h),
        in_specs=[in_spec_pred, in_spec_true],
        out_specs=pl.BlockSpec((None, 8, 128), lambda n, h: (n, 0, 0)),
        scratch_shapes=[
            pltpu.VMEM((h_tile, W), jnp.float32),  # sum(yp * yt) accumulator
            pltpu.VMEM((h_tile, W), jnp.float32),  # sum(yp + yt) accumulator
        ],
        compiler_params=pltpu.CompilerParams(
            dimension_semantics=("parallel", "arbitrary"),
        ),
        cost_estimate=cost,
    )(y_pred, y_true)

    # Tiny scalar combine in the wrapper (N*2 floats).
    intersection = jnp.sum(partials[:, 0, 0])
    total = jnp.sum(partials[:, 0, 1])
    return 1.0 - (2.0 * intersection + SMOOTH) / (total + SMOOTH)


def dice_loss_ref(y_pred, y_true):
    yp = y_pred[:, 0].reshape(-1).astype(jnp.float32)
    yt = y_true[:, 0].reshape(-1).astype(jnp.float32)
    inter = jnp.sum(yp * yt)
    return 1.0 - (2.0 * inter + SMOOTH) / (jnp.sum(yp) + jnp.sum(yt) + SMOOTH)


if __name__ == "__main__":
    key = jax.random.PRNGKey(0)
    k1, k2 = jax.random.split(key)
    # Small shapes consistent with the module: NCHW, batch=2, channels=4, 16x16
    x_shape = (2, 4, 16, 16)
    y_pred = jax.nn.sigmoid(jax.random.normal(k1, x_shape, dtype=jnp.float32))
    y_true = (jax.random.uniform(k2, x_shape) > 0.5).astype(jnp.float32)

    loss = dice_loss(y_pred, y_true)
    jax.block_until_ready(loss)

    ref = dice_loss_ref(y_pred, y_true)
    assert jnp.allclose(loss, ref, atol=1e-5, rtol=1e-5), (loss, ref)
    print("KERNEL_OK")
</pallas_src>

<mosaic_0001>
module attributes {stable_mosaic.version = 11 : i64} {
  func.func @_dice_partial_kernel(%arg0: i32, %arg1: i32, %arg2: memref<1x1x16x16xf32, #tpu.memory_space<vmem>>, %arg3: memref<1x1x16x16xf32, #tpu.memory_space<vmem>>, %arg4: memref<1x8x128xf32, #tpu.memory_space<vmem>>, %arg5: memref<16x16xf32, #tpu.memory_space<vmem>>, %arg6: memref<16x16xf32, #tpu.memory_space<vmem>>) attributes {dimension_semantics = [#tpu.dimension_semantics<parallel>, #tpu.dimension_semantics<arbitrary>], iteration_bounds = array<i64: 2, 1>, scalar_prefetch = 0 : i64, scratch_operands = 2 : i64, tpu.core_type = #tpu.core_type<tc>, window_params = [{transform_indices = @transform_0, window_bounds = array<i64: 1, 1, 16, 16>}, {transform_indices = @transform_1, window_bounds = array<i64: 1, 1, 16, 16>}, {transform_indices = @transform_2, window_bounds = array<i64: 1, 8, 128>}]} {
    %c0_i32 = arith.constant 0 : i32
    %0 = arith.cmpi eq, %arg1, %c0_i32 : i32
    %1 = arith.extui %0 : i1 to i32
    %c0_i32_0 = arith.constant 0 : i32
    %2 = arith.cmpi ne, %1, %c0_i32_0 : i32
    scf.if %2 {
      %cst = arith.constant 0.000000e+00 : f32
      %18 = vector.broadcast %cst : f32 to vector<16x16xf32>
      %c0_18 = arith.constant 0 : index
      %c0_19 = arith.constant 0 : index
      %19 = vector.load %arg5[%c0_18, %c0_19] : memref<16x16xf32, #tpu.memory_space<vmem>>, vector<16x16xf32>
      tpu.vector_store %arg5[%c0_18, %c0_19], %18 {strides = array<i32>} : memref<16x16xf32, #tpu.memory_space<vmem>>, vector<16x16xf32>,
      %cst_20 = arith.constant 0.000000e+00 : f32
      %20 = vector.broadcast %cst_20 : f32 to vector<16x16xf32>
      %c0_21 = arith.constant 0 : index
      %c0_22 = arith.constant 0 : index
      %21 = vector.load %arg6[%c0_21, %c0_22] : memref<16x16xf32, #tpu.memory_space<vmem>>, vector<16x16xf32>
      tpu.vector_store %arg6[%c0_21, %c0_22], %20 {strides = array<i32>} : memref<16x16xf32, #tpu.memory_space<vmem>>, vector<16x16xf32>,
    } else {
    }
    %c0 = arith.constant 0 : index
    %c0_1 = arith.constant 0 : index
    %c0_2 = arith.constant 0 : index
    %c0_3 = arith.constant 0 : index
    %3 = vector.load %arg2[%c0, %c0_1, %c0_2, %c0_3] : memref<1x1x16x16xf32, #tpu.memory_space<vmem>>, vector<1x1x16x16xf32>
    %4 = vector.shape_cast %3 : vector<1x1x16x16xf32> to vector<16x16xf32>
    %c0_4 = arith.constant 0 : index
    %c0_5 = arith.constant 0 : index
    %c0_6 = arith.constant 0 : index
    %c0_7 = arith.constant 0 : index
    %5 = vector.load %arg3[%c0_4, %c0_5, %c0_6, %c0_7] : memref<1x1x16x16xf32, #tpu.memory_space<vmem>>, vector<1x1x16x16xf32>
    %6 = vector.shape_cast %5 : vector<1x1x16x16xf32> to vector<16x16xf32>
    %c0_8 = arith.constant 0 : index
    %c0_9 = arith.constant 0 : index
    %7 = vector.load %arg5[%c0_8, %c0_9] : memref<16x16xf32, #tpu.memory_space<vmem>>, vector<16x16xf32>
    %8 = arith.mulf %4, %6 : vector<16x16xf32>
    %9 = arith.addf %7, %8 : vector<16x16xf32>
    %c0_10 = arith.constant 0 : index
    %c0_11 = arith.constant 0 : index
    %10 = vector.load %arg5[%c0_10, %c0_11] : memref<16x16xf32, #tpu.memory_space<vmem>>, vector<16x16xf32>
    tpu.vector_store %arg5[%c0_10, %c0_11], %9 {strides = array<i32>} : memref<16x16xf32, #tpu.memory_space<vmem>>, vector<16x16xf32>,
    %c0_12 = arith.constant 0 : index
    %c0_13 = arith.constant 0 : index
    %11 = vector.load %arg6[%c0_12, %c0_13] : memref<16x16xf32, #tpu.memory_space<vmem>>, vector<16x16xf32>
    %12 = arith.addf %4, %6 : vector<16x16xf32>
    %13 = arith.addf %11, %12 : vector<16x16xf32>
    %c0_14 = arith.constant 0 : index
    %c0_15 = arith.constant 0 : index
    %14 = vector.load %arg6[%c0_14, %c0_15] : memref<16x16xf32, #tpu.memory_space<vmem>>, vector<16x16xf32>
    tpu.vector_store %arg6[%c0_14, %c0_15], %13 {strides = array<i32>} : memref<16x16xf32, #tpu.memory_space<vmem>>, vector<16x16xf32>,
    %c0_i32_16 = arith.constant 0 : i32
    %15 = arith.cmpi eq, %arg1, %c0_i32_16 : i32
    %16 = arith.extui %15 : i1 to i32
    %c0_i32_17 = arith.constant 0 : i32
    %17 = arith.cmpi ne, %16, %c0_i32_17 : i32
    scf.if %17 {
      %c0_18 = arith.constant 0 : index
      %c0_19 = arith.constant 0 : index
      %18 = vector.load %arg5[%c0_18, %c0_19] : memref<16x16xf32, #tpu.memory_space<vmem>>, vector<16x16xf32>
      %19 = vector.shape_cast %18 : vector<16x16xf32> to vector<1x16x16xf32>
      %cst = arith.constant dense<0.000000e+00> : vector<1xf32>
      %20 = vector.multi_reduction <add>, %19, %cst [1, 2] : vector<1x16x16xf32> to vector<1xf32>
      %21 = vector.shape_cast %20 : vector<1xf32> to vector<1x1x1xf32>
      %22 = vector.extract %21[0, 0, 0] : f32 from vector<1x1x1xf32>
      %c0_20 = arith.constant 0 : index
      %c0_21 = arith.constant 0 : index
      %23 = vector.load %arg6[%c0_20, %c0_21] : memref<16x16xf32, #tpu.memory_space<vmem>>, vector<16x16xf32>
      %24 = vector.shape_cast %23 : vector<16x16xf32> to vector<1x16x16xf32>
      %cst_22 = arith.constant dense<0.000000e+00> : vector<1xf32>
      %25 = vector.multi_reduction <add>, %24, %cst_22 [1, 2] : vector<1x16x16xf32> to vector<1xf32>
      %26 = vector.shape_cast %25 : vector<1xf32> to vector<1x1x1xf32>
      %27 = vector.extract %26[0, 0, 0] : f32 from vector<1x1x1xf32>
      %28 = tpu.iota {dimensions = array<i32: 0>} : vector<8x128xi32>
      %29 = tpu.iota {dimensions = array<i32: 1>} : vector<8x128xi32>
      %c0_i32_23 = arith.constant 0 : i32
      %30 = vector.broadcast %c0_i32_23 : i32 to vector<8x128xi32>
      %31 = arith.cmpi eq, %28, %30 : vector<8x128xi32>
      %c0_i32_24 = arith.constant 0 : i32
      %32 = vector.broadcast %c0_i32_24 : i32 to vector<8x128xi32>
      %33 = arith.cmpi eq, %29, %32 : vector<8x128xi32>
      %34 = arith.andi %31, %33 : vector<8x128xi1>
      %c0_i32_25 = arith.constant 0 : i32
      %35 = vector.broadcast %c0_i32_25 : i32 to vector<8x128xi32>
      %36 = arith.cmpi eq, %28, %35 : vector<8x128xi32>
      %c1_i32 = arith.constant 1 : i32
      %37 = vector.broadcast %c1_i32 : i32 to vector<8x128xi32>
      %38 = arith.cmpi eq, %29, %37 : vector<8x128xi32>
      %39 = arith.andi %36, %38 : vector<8x128xi1>
      %cst_26 = arith.constant 0.000000e+00 : f32
      %40 = vector.broadcast %27 : f32 to vector<8x128xf32>
      %41 = vector.broadcast %cst_26 : f32 to vector<8x128xf32>
      %42 = arith.select %39, %40, %41 : vector<8x128xi1>, vector<8x128xf32>
      %43 = vector.broadcast %22 : f32 to vector<8x128xf32>
      %44 = arith.select %34, %43, %42 : vector<8x128xi1>, vector<8x128xf32>
      %c0_27 = arith.constant 0 : index
      %c0_28 = arith.constant 0 : index
      %c0_29 = arith.constant 0 : index
      %45 = vector.load %arg4[%c0_27, %c0_28, %c0_29] : memref<1x8x128xf32, #tpu.memory_space<vmem>>, vector<1x8x128xf32>
      %46 = vector.shape_cast %45 : vector<1x8x128xf32> to vector<8x128xf32>
      %47 = vector.shape_cast %44 : vector<8x128xf32> to vector<1x8x128xf32>
      tpu.vector_store %arg4[%c0_27, %c0_28, %c0_29], %47 {strides = array<i32>} : memref<1x8x128xf32, #tpu.memory_space<vmem>>, vector<1x8x128xf32>,
    } else {
    }
    return
  }
  func.func @transform_0(%arg0: i32, %arg1: i32) -> (i32, i32, i32, i32) {
    %c0_i32 = arith.constant 0 : i32
    %c0_i32_0 = arith.constant 0 : i32
    %c0_i32_1 = arith.constant 0 : i32
    return %arg0, %c0_i32, %arg1, %c0_i32_0 : i32, i32, i32, i32
  }
  func.func @transform_1(%arg0: i32, %arg1: i32) -> (i32, i32, i32, i32) {
    %c0_i32 = arith.constant 0 : i32
    %c0_i32_0 = arith.constant 0 : i32
    %c0_i32_1 = arith.constant 0 : i32
    return %arg0, %c0_i32, %arg1, %c0_i32_0 : i32, i32, i32, i32
  }
  func.func @transform_2(%arg0: i32, %arg1: i32) -> (i32, i32, i32) {
    %c0_i32 = arith.constant 0 : i32
    %c0_i32_0 = arith.constant 0 : i32
    %c0_i32_1 = arith.constant 0 : i32
    return %arg0, %c0_i32, %c0_i32_0 : i32, i32, i32
  }
}

</mosaic_0001>

<bundles_post_ra>
// kernel: tpu_custom_call.1
= control target key start
LH: loop header
LB: loop body
LE: loop exit
PB: predicated region body
PF: predicated region fallthrough
CT: control target
= control target key end

     0   :  { %7 = vsyncpa [#allocation5], 0  ;;  %s863_s0 = inlined_call_operand.hbm [shape: f32[2,4,16,16], index: 0, kind: input, shape index: {}]   ;;  %s864_s1 = inlined_call_operand.hbm [shape: f32[2,4,16,16], index: 1, kind: input, shape index: {}]   ;;  %s865_s2 = inlined_call_operand.hbm [shape: f32[2,8,128], index: 2, kind: output, shape index: {}]  }
   0x1   :  { %9 = vsyncpa [#allocation5 + $0x1], 0 }
   0x2   :  { %10 = vsyncpa [#allocation8], 0 }
   0x3   :  { %12 = vsyncpa [#allocation8 + $0x1], 0 }
   0x4   :  { %13 = vsyncpa [#allocation6], 0 }
   0x5   :  { %15 = vsyncpa [#allocation6 + $0x1], 0  ;;  %s677_s9 = smov 0   ;;  %s679_s10 = smov 0  }
   0x6   :  { %s681_s11 = smov 0   ;;  %s683_s12 = smov 0  }
   0x7   :  { %s685_s13 = smov 0   ;;  %s687_s14 = smov 0  }
   0x8 LB: > { %s420_s15 = sadd.s32 4294967295, %s654_s14   ;;  %s421_s16 = sadd.s32 4294967294, %s654_s14   ;;  %s654_s14 = sphi %s687_s14, %s21_s14   ;;  %s650_s13 = sphi %s685_s13, %s876_s13   ;;  %s646_s12 = sphi %s683_s12, %s875_s12   ;;  %s642_s11 = sphi %s681_s11, %s874_s11   ;;  %s638_s10 = sphi %s679_s10, %s873_s10   ;;  %s634_s9 = sphi %s677_s9, %s872_s9  }
   0x9   : > { %s33_s17 = sadd.s32 1, %s650_s13  ;;  %s42_s18 = sadd.s32 1, %s642_s11 }
   0xa   : > { %p35_p0 = scmp.ge.s32.totalorder %s33_s17, 2  ;;  %p49_p1 = scmp.ne.s32.totalorder %s642_s11, %s638_s10 }
   0xb   : > { %p50_p2 = scmp.eq.s32.totalorder %s654_s14, 0  ;;  %p55_p3 = scmp.ne.s32.totalorder %s638_s10, %s634_s9 }
   0xc   : > { %s878_s17 = smov (%p35_p0, %s33_s17), 0  ;;  %p56_p5 = scmp.eq.s32.totalorder %s420_s15, 0 }
   0xd   : > { %p718_p4 = por %p50_p2, %p49_p1  ;;  %s37_s20 = ssub.s32 %s650_s13, %s878_s17 }
   0xe   : > { %p107_p6 = scmp.eq.s32.totalorder %s420_s15, 1  ;;  %p40_p7 = scmp.eq.s32.totalorder %s37_s20, 0 }
   0xf   : > { %p724_p8 = por %p56_p5, %p55_p3  ;;  %p113_p10 = scmp.eq.s32.totalorder %s421_s16, 1 }
  0x10   : > { %p728_p9 = por %p107_p6, %p49_p1  ;;  %p423_p12 = scmp.ge.s32.totalorder %s654_s14, 2 }
  0x11   : > { %s733_s23 = scalar_select %p40_p7, %s642_s11, %s42_s18  }
  0x12   : > { %p735_p11 = por %p113_p10, %p55_p3  ;;  %p461_p13 = scmp.lt.s32.totalorder %s654_s14, 2 }
  0x13   : > { %s742_s25 = sand.u32 1, %s642_s11   ;;  %s438_s27 = sshll.u32 %s650_s13, 10 }
  0x14   : > { %s424_s26 = sshll.u32 %s742_s25, 4  ;;  %s145_s30 = scalar_lea.hbm %s863_s0, %s438_s27 }
  0x15   : > { %s137_s3 = scalar_lea.vmem [#allocation4], %s424_s26  ;;  %p755_p0 = pnand %p461_p13, %p718_p4 }
  0x16   : > { %s146_s4 = sshll.u32 %s137_s3, 4  ;;  %p430_p1 = scmp.ge.s32.totalorder %s654_s14, 1  ;;  %s147_s4 = int_to_ptr.vmem [resolvable:$true] %s146_s4 }
  0x17   : > { %s134_s6 = scalar_lea.sflag [#allocation5], %s742_s25  ;;  %p516_p2 = pneg %p755_p0 }
  0x18   : > { %s527_s7 = scalar_lea.vmem %s147_s4, 256  ;;  %s656_s8 = smov [#allocation4]  }
  0x19   : > { %p528_p3 = scmp.ne.s32.totalorder %s147_s4, %s527_s7  ;;  %s532_s15 = sshll.u32 %s656_s8, 4  ;;  %s533_s15 = int_to_ptr.vmem [resolvable:$false] %s532_s15 }
  0x1a   : > { %s534_s16 = scalar_lea.vmem %s533_s15, 512  ;;  %p535_p4 = scmp.lt.s32.totalorder %s147_s4, %s533_s15 }
  0x1b   : > { %p530_p5 = pnand %p528_p3, %p516_p2  ;;  %p536_p7 = scmp.lt.s32.totalorder %s534_s16, %s527_s7 }
  0x1d   : > { %p531_p6 = pneg %p530_p5  ;;  %p537_p10 = por %p536_p7, %p535_p4 }
  0x1f   : > { %p538_p13 = pnand %p537_p10, %p531_p6 }
  0x21   : > { %541 = shalt.err (!%p538_p13)
}
  0x22   : > { %s657_s18 = smov 128   ;;  %s658_s19 = smov 8  }
  0x23   : > { %453 = dma.hbm_to_vmem [thread:$0]  (!%p755_p0), %s145_s30, 256, %s147_s4, %s134_s6, %s657_s18, %s657_s18, %s658_s19  }
  0x24   : > { %p177_p3 = scmp.lt.s32.totalorder %s654_s14, 3  ;;  %s168_s29 = scalar_lea.hbm %s864_s1, %s438_s27 }
  0x25   : > { %s160_s7 = scalar_lea.vmem [#allocation7], %s424_s26  ;;  %s157_s15 = scalar_lea.sflag [#allocation8], %s742_s25 }
  0x26   : > { %p776_p5 = pnand %p430_p1, %p177_p3  ;;  %s169_s8 = sshll.u32 %s160_s7, 4  ;;  %s170_s8 = int_to_ptr.vmem [resolvable:$true] %s169_s8 }
  0x27   : > { %s555_s16 = scalar_lea.vmem %s170_s8, 256  ;;  %s659_s30 = smov [#allocation7]  }
  0x28   : > { %p556_p6 = scmp.ne.s32.totalorder %s170_s8, %s555_s16  ;;  %s560_s4 = sshll.u32 %s659_s30, 4  ;;  %s561_s4 = int_to_ptr.vmem [resolvable:$false] %s560_s4 }
  0x29   : > { %s562_s27 = scalar_lea.vmem %s561_s4, 512  ;;  %p563_p10 = scmp.lt.s32.totalorder %s170_s8, %s561_s4 }
  0x2a   : > { %p558_p4 = pnand %p556_p6, %p516_p2  ;;  %p564_p1 = scmp.lt.s32.totalorder %s562_s27, %s555_s16 }
  0x2c   : > { %p559_p7 = pneg %p558_p4  ;;  %p565_p13 = por %p564_p1, %p563_p10 }
  0x2e   : > { %p566_p3 = pnand %p565_p13, %p559_p7 }
  0x30   : > { %569 = shalt.err (!%p566_p3)
}
  0x31   : > { %456 = dma.hbm_to_vmem [thread:$0]  (!%p755_p0), %s168_s29, 256, %s170_s8, %s157_s15, %s657_s18, %s657_s18, %s658_s19  }
  0x32   : > { %181 = sbr.rel (%p776_p5) target bundleno = 300 (0x12c), region = 28  ;;  %s791_s25 = sand.u32 (!%p776_p5), 1, %s638_s10  }
  0x33   : > { %s431_s26 = sshll.u32 (!%p776_p5), %s791_s25, 4  ;;  %s184_s6 = scalar_lea.sflag (!%p776_p5), [#allocation5], %s791_s25 }
  0x34   : > { %s187_s20 = scalar_lea.vmem (!%p776_p5), [#allocation4], %s431_s26 }
  0x37   : > { %621 = dma.done.wait (%p724_p8), %s184_s6, 256  }
  0x38   : > { %623 = vsyncadd (%p724_p8), %s184_s6, 4294967040  ;;  %s193_s5 = scalar_lea.sflag [#allocation8], %s791_s25  ;;  %s196_s18 = scalar_lea.vmem [#allocation7], %s431_s26 }
  0x39   : > { %625 = dma.done.wait (%p724_p8), %s193_s5, 256  }
  0x3a   : > { %627 = vsyncadd (%p724_p8), %s193_s5, 4294967040  ;;  %vm228_vm0 = vcmask 130048   ;;  %v660_v0 = vmov 0.0   ;;  %v233_v1 = vld [vmem:[%s187_s20] sm:$0xff]  ;;  %v234_v2 = vld [vmem:[%s187_s20 + $0x8] sm:$0xff]  ;;  %v285_v41 = vlaneseq  ;;  %s433_s21 = sshll.u32 %s791_s25, 3 }
  0x3b   : > { %229 = vst.msk [vmem:[#allocation2] sm:$0xff] %vm228_vm0, %v660_v0  ;;  %230 = vst.msk [vmem:[#allocation2 + $0x8] sm:$0xff] %vm228_vm0, %v660_v0  ;;  %v235_v3 = vld [vmem:[%s196_s18] sm:$0xff]  ;;  %v236_v4 = vld [vmem:[%s196_s18 + $0x8] sm:$0xff]  ;;  %s435_s19 = sshll.u32 %s646_s12, 7  ;;  %s221_s29 = scalar_lea.vmem [#allocation9], %s433_s21 }
  0x3c   : > { %231 = vst.msk [vmem:[#allocation3] sm:$0xff] %vm228_vm0, %v660_v0  ;;  %232 = vst.msk [vmem:[#allocation3 + $0x8] sm:$0xff] %vm228_vm0, %v660_v0  ;;  %v239_v7 = vmul.f32 %v235_v3, %v233_v1  ;;  %v248_v8 = vadd.f32 %v235_v3, %v233_v1  ;;  %v240_v9 = vmul.f32 %v236_v4, %v234_v2  ;;  %v286_v42 = vshrl.u32 %v285_v41, 7  ;;  %s313_s3 = sshll.u32 %s221_s29, 4  ;;  %s821_s16 = scalar_lea.hbm %s865_s2, %s435_s19  ;;  %s314_s3 = int_to_ptr.vmem [resolvable:$true] %s313_s3 }
  0x3d   : > { %v249_v12 = vadd.f32 %v236_v4, %v234_v2  ;;  %v288_v43 = vand.u32 127, %v285_v41  ;;  %s300_s30 = scalar_lea.sflag [#allocation6], %s791_s25  ;;  %s570_s12 = scalar_lea.vmem %s314_s3, 128 }
  0x3e   : > { %vm289_vm1 = vcmp.eq.s32.totalorder %v286_v42, 0  ;;  %p571_p8 = scmp.ne.s32.totalorder %s314_s3, %s570_s12  ;;  %s661_s4 = smov [#allocation9]  }
  0x3f   : > { %vm292_vm2 = vcmp.eq.s32.totalorder %v288_v43, 1  ;;  %vm290_vm3 = vcmp.eq.s32.totalorder %v288_v43, 0  ;;  %s574_s27 = sshll.u32 %s661_s4, 4  ;;  %s575_s27 = int_to_ptr.vmem [resolvable:$false] %s574_s27 }
  0x40   : > { %vm293_vm4 = vmand %vm289_vm1, %vm292_vm2  ;;  %p572_p0 = pnand %p571_p8, %p728_p9  ;;  %s576_s26 = scalar_lea.vmem %s575_s27, 256 }
  0x41   : > { %vm291_vm5 = vmand %vm289_vm1, %vm290_vm3  ;;  %p577_p5 = scmp.lt.s32.totalorder %s314_s3, %s575_s27  ;;  %p578_p6 = scmp.lt.s32.totalorder %s576_s26, %s570_s12 }
  0x42   : > { %v237_v5 = vld [vmem:[#allocation2] sm:$0xff]  ;;  %v238_v6 = vld [vmem:[#allocation2 + $0x8] sm:$0xff]  ;;  %p573_p2 = pneg %p572_p0 }
  0x43   : > { %v246_v10 = vld [vmem:[#allocation3] sm:$0xff]  ;;  %v247_v11 = vld [vmem:[#allocation3 + $0x8] sm:$0xff]  ;;  %v241_v13 = vadd.f32 %v239_v7, %v237_v5  ;;  %v242_v15 = vadd.f32 %v240_v9, %v238_v6  ;;  %p579_p4 = por %p578_p6, %p577_p5 }
  0x44   : > { %v250_v14 = vadd.f32 %v248_v8, %v246_v10  ;;  %v251_v16 = vadd.f32 %v249_v12, %v247_v11 }
  0x45   : > { %244 = vst.msk [vmem:[#allocation2] sm:$0xff] %vm228_vm0, %v241_v13  ;;  %245 = vst.msk [vmem:[#allocation2 + $0x8] sm:$0xff] %vm228_vm0, %v242_v15  ;;  %p580_p7 = pnand %p579_p4, %p573_p2 }
  0x46   : > { %252 = vst.msk [vmem:[#allocation3] sm:$0xff] %vm228_vm0, %v250_v14  ;;  %253 = vst.msk [vmem:[#allocation3 + $0x8] sm:$0xff] %vm228_vm0, %v251_v16 }
  0x4c   : > { %v257_v17 = vld [vmem:[#allocation2] sm:$0xff]  ;;  %v258_v19 = vld [vmem:[#allocation2 + $0x8] sm:$0xff] }
  0x4d   : > { %v271_v18 = vld [vmem:[#allocation3] sm:$0xff]  ;;  %v259_v20 = vsel %vm228_vm0, %v257_v17, 0.0  ;;  %v272_v21 = vld [vmem:[#allocation3 + $0x8] sm:$0xff]  ;;  %v260_v22 = vsel %vm228_vm0, %v258_v19, 0.0 }
  0x4e   : > { %v273_v23 = vsel %vm228_vm0, %v271_v18, 0.0  ;;  %v274_v24 = vsel %vm228_vm0, %v272_v21, 0.0  ;;  %v261_v25 = vadd.f32 %v260_v22, %v259_v20 }
  0x4f   : > { %v275_v26 = vadd.f32 %v274_v24, %v273_v23 }
  0x50   : > { %262 = vadd.xlane.f32.xlu0 %v261_v25 }
  0x54   : > { %276 = vadd.xlane.f32.xlu0 %v275_v26 }
  0xd9   : > { %v263_v27 = vpop.xlane.xlu0 %262 }
  0xda   : > { %v264_v28 = vrot.slane %v263_v27, 4 }
  0xdc   : > { %v265_v29 = vadd.f32 %v264_v28, %v263_v27 }
  0xdd   : > { %v277_v30 = vpop.xlane.xlu0 %276 }
  0xde   : > { %v266_v31 = vrot.slane %v265_v29, 2  ;;  %v278_v32 = vrot.slane %v277_v30, 4 }
  0xe0   : > { %v279_v33 = vadd.f32 %v278_v32, %v277_v30  ;;  %v267_v34 = vadd.f32 %v266_v31, %v265_v29 }
  0xe2   : > { %v280_v35 = vrot.slane %v279_v33, 2  ;;  %v268_v36 = vrot.slane %v267_v34, 1 }
  0xe4   : > { %v281_v37 = vadd.f32 %v280_v35, %v279_v33  ;;  %v269_v38 = vadd.f32 %v268_v36, %v267_v34 }
  0xe6   : > { %440 = vpush %v269_v38  ;;  %v282_v39 = vrot.slane %v281_v37, 1 }
  0xe8   : > { %v283_v40 = vadd.f32 %v282_v39, %v281_v37 }
  0xea   : > { %442 = vpush %v283_v40 }
 0x117   : > { %s441_s28 = spop %440 }
 0x118   : > { %v296_v45 = vstv %s441_s28 }
 0x11b   : > { %s443_s7 = spop %442 }
 0x11c   : > { %v294_v44 = vstv %s443_s7 }
 0x11d   : > { %v295_v46 = vsel %vm293_vm4, %v294_v44, 0.0 }
 0x11e   : > { %v297_v47 = vsel %vm291_vm5, %v296_v45, %v295_v46 }
 0x11f   : > { %298 = vst [vmem:[%s221_s29] sm:$0xff] %v297_v47 }
 0x120   : > { %583 = shalt.err (!%p580_p7)
}
 0x121   : > { %s584_s6 = scalar_lea.hbm %s821_s16, 128  ;;  %s588_s5 = scalar_lea.hbm %s865_s2, 256 }
 0x122   : > { %p585_p10 = scmp.ne.s32.totalorder %s821_s16, %s584_s6  ;;  %p589_p3 = scmp.lt.s32.totalorder %s821_s16, %s865_s2 }
 0x123   : > { %p590_p8 = scmp.lt.s32.totalorder %s588_s5, %s584_s6 }
 0x124   : > { %p586_p1 = pnand %p585_p10, %p728_p9 }
 0x125   : > { %p591_p0 = por %p590_p8, %p589_p3 }
 0x126   : > { %p587_p13 = pneg %p586_p1 }
 0x128   : > { %p592_p2 = pnand %p591_p0, %p587_p13 }
 0x12a   : > { %595 = shalt.err (!%p592_p2)
}
 0x12b   : > { %448 = dma.vmem_to_hbm [thread:$0]  (%p728_p9), %s314_s3, 128, %s821_s16, %s300_s30  }
 0x12c PF: > { %s325_s19 = sand.u32 1, %s634_s9   ;;  %p458_p5 = pnand %p423_p12, %p735_p11 }
 0x12d   : > { %s326_s28 = scalar_lea.sflag [#allocation6], %s325_s19 }
 0x12e   : > { %p459_p6 = pneg %p458_p5 }
 0x130   : > { %629 = dma.done.wait (%p459_p6), %s326_s28, 128  }
 0x131   : > { %631 = vsyncadd (%p459_p6), %s326_s28, 4294967168  ;;  %s21_s14 = sadd.s32 1, %s654_s14   ;;  %s872_s9 = smov %s638_s10 }
 0x132   : > { %p18_p4 = scmp.ge.s32.totalorder %s21_s14, 4   ;;  %s873_s10 = smov %s642_s11 }
 0x133   : > { %s874_s11 = smov %s733_s23  ;;  %s875_s12 = smov %s650_s13 }
 0x134   : > { %s876_s13 = smov %s878_s17  ;;  %20 = sbr.rel (!%p18_p4) target bundleno = 8 (0x8), region = 94 }
 0x139   :  { %331 = vsyncpa [#allocation5], 1 }
 0x13a   :  { %333 = vsyncpa [#allocation5 + $0x1], 1 }
 0x13b   :  { %334 = vsyncpa [#allocation8], 1 }
 0x13c   :  { %336 = vsyncpa [#allocation8 + $0x1], 1 }
 0x13d   :  { %337 = vsyncpa [#allocation6], 1 }
 0x13e   :  { %339 = vsyncpa [#allocation6 + $0x1], 1 }

</bundles_post_ra>
